<compile_context>
chip_gen: v7x
topology: tpu7x:2x2x1
jax: 0.10.0
libtpu: 0.0.40
codegen_flags: <defaults>
</compile_context>

<pallas_src>
import jax
import jax.numpy as jnp
from jax.experimental import pallas as pl
from jax.experimental.pallas import tpu as pltpu


def _round_up(x, m):
    return ((x + m - 1) // m) * m


# ---------------------------------------------------------------------------
# Fused whole-network kernel (one batch block per grid step)
# ---------------------------------------------------------------------------
def _make_fused_kernel(layer_cfgs, b_blk):
    """Kernel processing B_blk images through every layer.

    Activation layout (input, scratch and output alike) is 2-D:
      rows  = h * B_blk + b      (spatial row major, image minor)
      lanes = w * C + c          (spatial col major, channel minor)
    With this layout the banded weight matrix absorbs both the kw taps and the
    width stride, so only contiguous, statically-sliced copies are needed.
    """
    n_layers = len(layer_cfgs)

    def kernel(x_ref, *rest):
        w_refs = [rest[2 * l] for l in range(n_layers)]
        sh_refs = [rest[2 * l + 1] for l in range(n_layers)]
        out_ref = rest[2 * n_layers]
        scratch = rest[2 * n_layers + 1:]
        act_refs = scratch[:n_layers - 1]          # inter-layer activations (bf16)
        col_refs = scratch[n_layers - 1:]          # per-layer LHS staging (bf16)

        src = x_ref
        for l, cfg in enumerate(layer_cfgs):
            kh, s, oh = cfg["kh"], cfg["stride"], cfg["oh"]
            wc = cfg["w_in"] * cfg["c_in"]         # lane width of one input row
            col = col_refs[l]
            dst = out_ref if l == n_layers - 1 else act_refs[l]

            a = src[...]                           # (H_in*B, W_in*C_in) bf16
            # Build the banded-matmul LHS in VMEM: row (p*B + b) holds input
            # rows s*p .. s*p+kh-1 of image b, concatenated along lanes.
            # All offsets are static; every copy is a contiguous slice whose
            # sublane start is a multiple of 8 (b_blk % 8 == 0).
            for i in range(kh):
                for p in range(oh):
                    r0 = (s * p + i) * b_blk
                    col[p * b_blk:(p + 1) * b_blk, i * wc:(i + 1) * wc] = \
                        a[r0:r0 + b_blk, :]

            # One MXU matmul per layer; taps/stride accumulate inside the MXU.
            y = jnp.dot(col[...], w_refs[l][...],
                        preferred_element_type=jnp.float32)  # (oh*B, ow*Cout)
            y = jnp.maximum(y + sh_refs[l][...], 0.0)         # bias/BN shift + ReLU
            dst[...] = y.astype(dst.dtype)
            src = dst

    return kernel


# ---------------------------------------------------------------------------
# Wrapper: parameter folding (BN + bias + taps + stride), specs, pallas_call
# ---------------------------------------------------------------------------
def conv_module_forward(x_nchw, layers):
    """Eval-mode forward of the `Conv` module. Returns (N, C*H*W) features."""
    eps = 1e-5
    x = x_nchw.astype(jnp.float32)
    N, Cin, H, W = x.shape

    # Batch blocking: multiple of 8 so every sublane offset is tile aligned;
    # capped at 32 to keep per-step VMEM small and not over-pad tiny batches.
    b_blk = min(32, _round_up(N, 8))
    n_pad = _round_up(N, b_blk)
    nb = n_pad // b_blk

    # NCHW -> per-block (H*B, W*C) layout, bf16 (halves input DMA traffic).
    xp = jnp.pad(x, ((0, n_pad - N), (0, 0), (0, 0), (0, 0)))
    xa = xp.reshape(nb, b_blk, Cin, H, W)
    xa = jnp.transpose(xa, (0, 3, 1, 4, 2))            # (nb, H, B, W, C)
    xa = xa.reshape(nb, H * b_blk, W * Cin).astype(jnp.bfloat16)

    layer_cfgs = []
    weight_args = []
    cur_h, cur_w, cur_c = H, W, Cin
    flops = 0
    for (w, b, gamma, beta, rmean, rvar, kh, kw, s) in layers:
        cout, cin = int(w.shape[0]), int(w.shape[1])
        assert cin == cur_c
        oh = (cur_h - kh) // s + 1
        ow = (cur_w - kw) // s + 1

        # Fold conv bias + inference BatchNorm into a weight scale + shift.
        scale = gamma / jnp.sqrt(rvar + eps)                       # (Cout,)
        shift = beta + (b - rmean) * scale                         # (Cout,)
        wt = jnp.transpose(w * scale[:, None, None, None],
                           (2, 3, 1, 0))                           # (kh,kw,cin,cout)

        # Banded ("Toeplitz") weights: fold kw taps AND the width stride into
        # the contraction.  band[(i*W_in + u)*cin + c, q*cout + n] =
        #   wt[i, u - s*q, c, n] when 0 <= u - s*q < kw, else 0.
        band = jnp.zeros((kh, cur_w, cin, ow, cout), jnp.float32)
        for q in range(ow):
            for j in range(kw):
                band = band.at[:, s * q + j, :, q, :].set(wt[:, j, :, :])
        band = band.reshape(kh * cur_w * cin, ow * cout).astype(jnp.bfloat16)
        shift_row = jnp.tile(shift, ow).reshape(1, ow * cout).astype(jnp.float32)

        weight_args += [band, shift_row]
        layer_cfgs.append(dict(kh=kh, stride=s, oh=oh, ow=ow,
                               w_in=cur_w, c_in=cin,
                               k_dim=kh * cur_w * cin,
                               n_lane=ow * cout, cout=cout))
        # Honest conv FLOPs (true cin/cout, no padding).
        flops += 2 * N * oh * ow * kh * kw * cin * cout
        cur_h, cur_w, cur_c = oh, ow, cout

    last = layer_cfgs[-1]
    kernel = _make_fused_kernel(layer_cfgs, b_blk)

    in_specs = [pl.BlockSpec((None, H * b_blk, W * Cin), lambda n: (n, 0, 0))]
    for arr in weight_args:
        in_specs.append(pl.BlockSpec(arr.shape, lambda n: (0, 0)))

    out_specs = pl.BlockSpec((None, last["oh"] * b_blk, last["n_lane"]),
                             lambda n: (n, 0, 0))
    out_shape = jax.ShapeDtypeStruct((nb, last["oh"] * b_blk, last["n_lane"]),
                                     jnp.float32)

    scratch_shapes = (
        [pltpu.VMEM((cfg["oh"] * b_blk, cfg["n_lane"]), jnp.bfloat16)
         for cfg in layer_cfgs[:-1]] +
        [pltpu.VMEM((cfg["oh"] * b_blk, cfg["k_dim"]), jnp.bfloat16)
         for cfg in layer_cfgs])

    bytes_accessed = int(
        xa.size * xa.dtype.itemsize
        + sum(int(a.size) * a.dtype.itemsize for a in weight_args)
        + nb * last["oh"] * b_blk * last["n_lane"] * 4)

    out_raw = pl.pallas_call(
        kernel,
        out_shape=out_shape,
        grid_spec=pltpu.PrefetchScalarGridSpec(
            num_scalar_prefetch=0,
            grid=(nb,),
            in_specs=in_specs,
            out_specs=out_specs,
            scratch_shapes=scratch_shapes),
        compiler_params=pltpu.CompilerParams(
            dimension_semantics=("parallel",),        # batch blocks across TCs
            vmem_limit_bytes=32 * 1024 * 1024),       # actual usage << 1 MiB
        cost_estimate=pl.CostEstimate(
            flops=int(flops), transcendentals=0,
            bytes_accessed=bytes_accessed),
    )(xa, *weight_args)

    # (nb, oh*B, ow*Cout) -> (N, Cout, oh, ow) -> PyTorch NCHW-order flatten.
    out = out_raw.reshape(nb, last["oh"], b_blk, last["ow"], last["cout"])
    out = jnp.transpose(out, (0, 2, 4, 1, 3))          # (nb, B, C, oh, ow)
    out = out.reshape(n_pad, last["cout"] * last["oh"] * last["ow"])
    return out[:N]


# ---------------------------------------------------------------------------
# Pure-JAX reference (eval-mode Conv2d -> BN -> Dropout(id) -> ReLU, flatten)
# ---------------------------------------------------------------------------
def _reference_forward(x_nchw, layers):
    eps = 1e-5
    x = x_nchw.astype(jnp.float32)
    for (w, b, gamma, beta, rmean, rvar, kh, kw, s) in layers:
        y = jax.lax.conv_general_dilated(
            x, w, window_strides=(s, s), padding="VALID",
            dimension_numbers=("NCHW", "OIHW", "NCHW"))
        y = y + b[None, :, None, None]
        scale = gamma / jnp.sqrt(rvar + eps)
        y = (y - rmean[None, :, None, None]) * scale[None, :, None, None] \
            + beta[None, :, None, None]
        x = jnp.maximum(y, 0.0)
    return x.reshape(x.shape[0], -1)


# ---------------------------------------------------------------------------
# Deterministic parameter construction (mirrors nn.Conv2d / nn.BatchNorm2d init)
# ---------------------------------------------------------------------------
def make_layers(key, channels, kernels, strides):
    layers = []
    for i in range(len(channels) - 1):
        cin, cout = channels[i], channels[i + 1]
        k, s = kernels[i], strides[i]
        key, kw_key, kb_key = jax.random.split(key, 3)
        fan_in = cin * k * k
        bound = 1.0 / jnp.sqrt(fan_in)
        w = jax.random.uniform(kw_key, (cout, cin, k, k),
                               minval=-bound, maxval=bound, dtype=jnp.float32)
        b = jax.random.uniform(kb_key, (cout,),
                               minval=-bound, maxval=bound, dtype=jnp.float32)
        gamma = jnp.ones((cout,), jnp.float32)
        beta = jnp.zeros((cout,), jnp.float32)
        rmean = jnp.zeros((cout,), jnp.float32)
        rvar = jnp.ones((cout,), jnp.float32)
        layers.append((w, b, gamma, beta, rmean, rvar, k, k, s))
    return layers


if __name__ == "__main__":
    # params = {'channels': [4, 8, 8], 'kernels': [3, 3], 'strides': [2, 2],
    #           'dropouts': [0.0, 0.0], 'end_layer': False}
    channels = [4, 8, 8]
    kernels = [3, 3]
    strides = [2, 2]

    key = jax.random.PRNGKey(0)
    key, xkey = jax.random.split(key)
    x = jax.random.normal(xkey, (2, 4, 16, 16), dtype=jnp.float32)  # NCHW

    layers = make_layers(key, channels, kernels, strides)

    fwd = jax.jit(lambda xx: conv_module_forward(xx, layers))
    out = jax.block_until_ready(fwd(x))

    # Sanity: spatial sizes 16 -> 7 -> 3, flat features = 8*3*3 = 72
    assert out.shape == (2, 72), out.shape
    assert bool(jnp.all(out >= 0.0))  # ReLU output

    # Numerical check vs pure-JAX f32 reference (bf16 MXU -> loose tolerance).
    ref = jax.block_until_ready(_reference_forward(x, layers))
    max_err = float(jnp.max(jnp.abs(out - ref)))
    assert max_err < 0.1, f"mismatch vs reference: {max_err}"

    print("KERNEL_OK")
</pallas_src>

<mosaic_0001>
module attributes {stable_mosaic.version = 11 : i64} {
  func.func @kernel(%arg0: i32, %arg1: memref<1x128x64xbf16, #tpu.memory_space<vmem>>, %arg2: memref<192x56xbf16, #tpu.memory_space<vmem>>, %arg3: memref<1x56xf32, #tpu.memory_space<vmem>>, %arg4: memref<168x24xbf16, #tpu.memory_space<vmem>>, %arg5: memref<1x24xf32, #tpu.memory_space<vmem>>, %arg6: memref<1x24x24xf32, #tpu.memory_space<vmem>>, %arg7: memref<56x56xbf16, #tpu.memory_space<vmem>>, %arg8: memref<56x192xbf16, #tpu.memory_space<vmem>>, %arg9: memref<24x168xbf16, #tpu.memory_space<vmem>>) attributes {dimension_semantics = [#tpu.dimension_semantics<parallel>], iteration_bounds = array<i64: 1>, scalar_prefetch = 0 : i64, scratch_operands = 3 : i64, tpu.core_type = #tpu.core_type<tc>, window_params = [{transform_indices = @transform_0, window_bounds = array<i64: 1, 128, 64>}, {pipeline_mode = #tpu.pipeline_mode<synchronous>, transform_indices = @transform_1, window_bounds = array<i64: 192, 56>}, {pipeline_mode = #tpu.pipeline_mode<synchronous>, transform_indices = @transform_2, window_bounds = array<i64: 1, 56>}, {pipeline_mode = #tpu.pipeline_mode<synchronous>, transform_indices = @transform_3, window_bounds = array<i64: 168, 24>}, {pipeline_mode = #tpu.pipeline_mode<synchronous>, transform_indices = @transform_4, window_bounds = array<i64: 1, 24>}, {transform_indices = @transform_5, window_bounds = array<i64: 1, 24, 24>}]} {
    %c0 = arith.constant 0 : index
    %c0_0 = arith.constant 0 : index
    %c0_1 = arith.constant 0 : index
    %0 = vector.load %arg1[%c0, %c0_0, %c0_1] : memref<1x128x64xbf16, #tpu.memory_space<vmem>>, vector<1x128x64xbf16>
    %1 = vector.shape_cast %0 : vector<1x128x64xbf16> to vector<128x64xbf16>
    %2 = vector.extract_strided_slice %1 {offsets = [0, 0], sizes = [8, 64], strides = [1, 1]} : vector<128x64xbf16> to vector<8x64xbf16>
    %c0_2 = arith.constant 0 : index
    %c0_3 = arith.constant 0 : index
    %3 = vector.load %arg8[%c0_2, %c0_3] : memref<56x192xbf16, #tpu.memory_space<vmem>>, vector<8x64xbf16>
    tpu.vector_store %arg8[%c0_2, %c0_3], %2 {strides = array<i32>} : memref<56x192xbf16, #tpu.memory_space<vmem>>, vector<8x64xbf16>,
    %4 = vector.extract_strided_slice %1 {offsets = [16, 0], sizes = [8, 64], strides = [1, 1]} : vector<128x64xbf16> to vector<8x64xbf16>
    %c8 = arith.constant 8 : index
    %c0_4 = arith.constant 0 : index
    %5 = vector.load %arg8[%c8, %c0_4] : memref<56x192xbf16, #tpu.memory_space<vmem>>, vector<8x64xbf16>
    tpu.vector_store %arg8[%c8, %c0_4], %4 {strides = array<i32>} : memref<56x192xbf16, #tpu.memory_space<vmem>>, vector<8x64xbf16>,
    %6 = vector.extract_strided_slice %1 {offsets = [32, 0], sizes = [8, 64], strides = [1, 1]} : vector<128x64xbf16> to vector<8x64xbf16>
    %c16 = arith.constant 16 : index
    %c0_5 = arith.constant 0 : index
    %7 = vector.load %arg8[%c16, %c0_5] : memref<56x192xbf16, #tpu.memory_space<vmem>>, vector<8x64xbf16>
    tpu.vector_store %arg8[%c16, %c0_5], %6 {strides = array<i32>} : memref<56x192xbf16, #tpu.memory_space<vmem>>, vector<8x64xbf16>,
    %8 = vector.extract_strided_slice %1 {offsets = [48, 0], sizes = [8, 64], strides = [1, 1]} : vector<128x64xbf16> to vector<8x64xbf16>
    %c24 = arith.constant 24 : index
    %c0_6 = arith.constant 0 : index
    %9 = vector.load %arg8[%c24, %c0_6] : memref<56x192xbf16, #tpu.memory_space<vmem>>, vector<8x64xbf16>
    tpu.vector_store %arg8[%c24, %c0_6], %8 {strides = array<i32>} : memref<56x192xbf16, #tpu.memory_space<vmem>>, vector<8x64xbf16>,
    %10 = vector.extract_strided_slice %1 {offsets = [64, 0], sizes = [8, 64], strides = [1, 1]} : vector<128x64xbf16> to vector<8x64xbf16>
    %c32 = arith.constant 32 : index
    %c0_7 = arith.constant 0 : index
    %11 = vector.load %arg8[%c32, %c0_7] : memref<56x192xbf16, #tpu.memory_space<vmem>>, vector<8x64xbf16>
    tpu.vector_store %arg8[%c32, %c0_7], %10 {strides = array<i32>} : memref<56x192xbf16, #tpu.memory_space<vmem>>, vector<8x64xbf16>,
    %12 = vector.extract_strided_slice %1 {offsets = [80, 0], sizes = [8, 64], strides = [1, 1]} : vector<128x64xbf16> to vector<8x64xbf16>
    %c40 = arith.constant 40 : index
    %c0_8 = arith.constant 0 : index
    %13 = vector.load %arg8[%c40, %c0_8] : memref<56x192xbf16, #tpu.memory_space<vmem>>, vector<8x64xbf16>
    tpu.vector_store %arg8[%c40, %c0_8], %12 {strides = array<i32>} : memref<56x192xbf16, #tpu.memory_space<vmem>>, vector<8x64xbf16>,
    %14 = vector.extract_strided_slice %1 {offsets = [96, 0], sizes = [8, 64], strides = [1, 1]} : vector<128x64xbf16> to vector<8x64xbf16>
    %c48 = arith.constant 48 : index
    %c0_9 = arith.constant 0 : index
    %15 = vector.load %arg8[%c48, %c0_9] : memref<56x192xbf16, #tpu.memory_space<vmem>>, vector<8x64xbf16>
    tpu.vector_store %arg8[%c48, %c0_9], %14 {strides = array<i32>} : memref<56x192xbf16, #tpu.memory_space<vmem>>, vector<8x64xbf16>,
    %16 = vector.extract_strided_slice %1 {offsets = [8, 0], sizes = [8, 64], strides = [1, 1]} : vector<128x64xbf16> to vector<8x64xbf16>
    %c0_10 = arith.constant 0 : index
    %c64 = arith.constant 64 : index
    %17 = vector.load %arg8[%c0_10, %c64] : memref<56x192xbf16, #tpu.memory_space<vmem>>, vector<8x64xbf16>
    tpu.vector_store %arg8[%c0_10, %c64], %16 {strides = array<i32>} : memref<56x192xbf16, #tpu.memory_space<vmem>>, vector<8x64xbf16>,
    %18 = vector.extract_strided_slice %1 {offsets = [24, 0], sizes = [8, 64], strides = [1, 1]} : vector<128x64xbf16> to vector<8x64xbf16>
    %c8_11 = arith.constant 8 : index
    %c64_12 = arith.constant 64 : index
    %19 = vector.load %arg8[%c8_11, %c64_12] : memref<56x192xbf16, #tpu.memory_space<vmem>>, vector<8x64xbf16>
    tpu.vector_store %arg8[%c8_11, %c64_12], %18 {strides = array<i32>} : memref<56x192xbf16, #tpu.memory_space<vmem>>, vector<8x64xbf16>,
    %20 = vector.extract_strided_slice %1 {offsets = [40, 0], sizes = [8, 64], strides = [1, 1]} : vector<128x64xbf16> to vector<8x64xbf16>
    %c16_13 = arith.constant 16 : index
    %c64_14 = arith.constant 64 : index
    %21 = vector.load %arg8[%c16_13, %c64_14] : memref<56x192xbf16, #tpu.memory_space<vmem>>, vector<8x64xbf16>
    tpu.vector_store %arg8[%c16_13, %c64_14], %20 {strides = array<i32>} : memref<56x192xbf16, #tpu.memory_space<vmem>>, vector<8x64xbf16>,
    %22 = vector.extract_strided_slice %1 {offsets = [56, 0], sizes = [8, 64], strides = [1, 1]} : vector<128x64xbf16> to vector<8x64xbf16>
    %c24_15 = arith.constant 24 : index
    %c64_16 = arith.constant 64 : index
    %23 = vector.load %arg8[%c24_15, %c64_16] : memref<56x192xbf16, #tpu.memory_space<vmem>>, vector<8x64xbf16>
    tpu.vector_store %arg8[%c24_15, %c64_16], %22 {strides = array<i32>} : memref<56x192xbf16, #tpu.memory_space<vmem>>, vector<8x64xbf16>,
    %24 = vector.extract_strided_slice %1 {offsets = [72, 0], sizes = [8, 64], strides = [1, 1]} : vector<128x64xbf16> to vector<8x64xbf16>
    %c32_17 = arith.constant 32 : index
    %c64_18 = arith.constant 64 : index
    %25 = vector.load %arg8[%c32_17, %c64_18] : memref<56x192xbf16, #tpu.memory_space<vmem>>, vector<8x64xbf16>
    tpu.vector_store %arg8[%c32_17, %c64_18], %24 {strides = array<i32>} : memref<56x192xbf16, #tpu.memory_space<vmem>>, vector<8x64xbf16>,
    %26 = vector.extract_strided_slice %1 {offsets = [88, 0], sizes = [8, 64], strides = [1, 1]} : vector<128x64xbf16> to vector<8x64xbf16>
    %c40_19 = arith.constant 40 : index
    %c64_20 = arith.constant 64 : index
    %27 = vector.load %arg8[%c40_19, %c64_20] : memref<56x192xbf16, #tpu.memory_space<vmem>>, vector<8x64xbf16>
    tpu.vector_store %arg8[%c40_19, %c64_20], %26 {strides = array<i32>} : memref<56x192xbf16, #tpu.memory_space<vmem>>, vector<8x64xbf16>,
    %28 = vector.extract_strided_slice %1 {offsets = [104, 0], sizes = [8, 64], strides = [1, 1]} : vector<128x64xbf16> to vector<8x64xbf16>
    %c48_21 = arith.constant 48 : index
    %c64_22 = arith.constant 64 : index
    %29 = vector.load %arg8[%c48_21, %c64_22] : memref<56x192xbf16, #tpu.memory_space<vmem>>, vector<8x64xbf16>
    tpu.vector_store %arg8[%c48_21, %c64_22], %28 {strides = array<i32>} : memref<56x192xbf16, #tpu.memory_space<vmem>>, vector<8x64xbf16>,
    %30 = vector.extract_strided_slice %1 {offsets = [16, 0], sizes = [8, 64], strides = [1, 1]} : vector<128x64xbf16> to vector<8x64xbf16>
    %c0_23 = arith.constant 0 : index
    %c128 = arith.constant 128 : index
    %31 = vector.load %arg8[%c0_23, %c128] : memref<56x192xbf16, #tpu.memory_space<vmem>>, vector<8x64xbf16>
    tpu.vector_store %arg8[%c0_23, %c128], %30 {strides = array<i32>} : memref<56x192xbf16, #tpu.memory_space<vmem>>, vector<8x64xbf16>,
    %32 = vector.extract_strided_slice %1 {offsets = [32, 0], sizes = [8, 64], strides = [1, 1]} : vector<128x64xbf16> to vector<8x64xbf16>
    %c8_24 = arith.constant 8 : index
    %c128_25 = arith.constant 128 : index
    %33 = vector.load %arg8[%c8_24, %c128_25] : memref<56x192xbf16, #tpu.memory_space<vmem>>, vector<8x64xbf16>
    tpu.vector_store %arg8[%c8_24, %c128_25], %32 {strides = array<i32>} : memref<56x192xbf16, #tpu.memory_space<vmem>>, vector<8x64xbf16>,
    %34 = vector.extract_strided_slice %1 {offsets = [48, 0], sizes = [8, 64], strides = [1, 1]} : vector<128x64xbf16> to vector<8x64xbf16>
    %c16_26 = arith.constant 16 : index
    %c128_27 = arith.constant 128 : index
    %35 = vector.load %arg8[%c16_26, %c128_27] : memref<56x192xbf16, #tpu.memory_space<vmem>>, vector<8x64xbf16>
    tpu.vector_store %arg8[%c16_26, %c128_27], %34 {strides = array<i32>} : memref<56x192xbf16, #tpu.memory_space<vmem>>, vector<8x64xbf16>,
    %36 = vector.extract_strided_slice %1 {offsets = [64, 0], sizes = [8, 64], strides = [1, 1]} : vector<128x64xbf16> to vector<8x64xbf16>
    %c24_28 = arith.constant 24 : index
    %c128_29 = arith.constant 128 : index
    %37 = vector.load %arg8[%c24_28, %c128_29] : memref<56x192xbf16, #tpu.memory_space<vmem>>, vector<8x64xbf16>
    tpu.vector_store %arg8[%c24_28, %c128_29], %36 {strides = array<i32>} : memref<56x192xbf16, #tpu.memory_space<vmem>>, vector<8x64xbf16>,
    %38 = vector.extract_strided_slice %1 {offsets = [80, 0], sizes = [8, 64], strides = [1, 1]} : vector<128x64xbf16> to vector<8x64xbf16>
    %c32_30 = arith.constant 32 : index
    %c128_31 = arith.constant 128 : index
    %39 = vector.load %arg8[%c32_30, %c128_31] : memref<56x192xbf16, #tpu.memory_space<vmem>>, vector<8x64xbf16>
    tpu.vector_store %arg8[%c32_30, %c128_31], %38 {strides = array<i32>} : memref<56x192xbf16, #tpu.memory_space<vmem>>, vector<8x64xbf16>,
    %40 = vector.extract_strided_slice %1 {offsets = [96, 0], sizes = [8, 64], strides = [1, 1]} : vector<128x64xbf16> to vector<8x64xbf16>
    %c40_32 = arith.constant 40 : index
    %c128_33 = arith.constant 128 : index
    %41 = vector.load %arg8[%c40_32, %c128_33] : memref<56x192xbf16, #tpu.memory_space<vmem>>, vector<8x64xbf16>
    tpu.vector_store %arg8[%c40_32, %c128_33], %40 {strides = array<i32>} : memref<56x192xbf16, #tpu.memory_space<vmem>>, vector<8x64xbf16>,
    %42 = vector.extract_strided_slice %1 {offsets = [112, 0], sizes = [8, 64], strides = [1, 1]} : vector<128x64xbf16> to vector<8x64xbf16>
    %c48_34 = arith.constant 48 : index
    %c128_35 = arith.constant 128 : index
    %43 = vector.load %arg8[%c48_34, %c128_35] : memref<56x192xbf16, #tpu.memory_space<vmem>>, vector<8x64xbf16>
    tpu.vector_store %arg8[%c48_34, %c128_35], %42 {strides = array<i32>} : memref<56x192xbf16, #tpu.memory_space<vmem>>, vector<8x64xbf16>,
    %c0_36 = arith.constant 0 : index
    %c0_37 = arith.constant 0 : index
    %44 = vector.load %arg8[%c0_36, %c0_37] : memref<56x192xbf16, #tpu.memory_space<vmem>>, vector<56x192xbf16>
    %c0_38 = arith.constant 0 : index
    %c0_39 = arith.constant 0 : index
    %45 = vector.load %arg2[%c0_38, %c0_39] : memref<192x56xbf16, #tpu.memory_space<vmem>>, vector<192x56xbf16>
    %cst = arith.constant dense<0.000000e+00> : vector<56x56xf32>
    %46 = tpu.matmul %44, %45, %cst {dimension_numbers = #tpu.dot_dimension_numbers<[1], [0], [0], [1], [0, 0, 1, 1], [], []>} : vector<56x192xbf16>, vector<192x56xbf16>, vector<56x56xf32> -> vector<56x56xf32>
    %c0_40 = arith.constant 0 : index
    %c0_41 = arith.constant 0 : index
    %47 = vector.load %arg3[%c0_40, %c0_41] : memref<1x56xf32, #tpu.memory_space<vmem>>, vector<1x56xf32>
    %48 = vector.broadcast %47 : vector<1x56xf32> to vector<56x56xf32>
    %49 = arith.addf %46, %48 : vector<56x56xf32>
    %cst_42 = arith.constant 0.000000e+00 : f32
    %50 = vector.broadcast %cst_42 : f32 to vector<56x56xf32>
    %51 = arith.maximumf %49, %50 : vector<56x56xf32>
    %52 = arith.truncf %51 : vector<56x56xf32> to vector<56x56xbf16>
    %c0_43 = arith.constant 0 : index
    %c0_44 = arith.constant 0 : index
    %53 = vector.load %arg7[%c0_43, %c0_44] : memref<56x56xbf16, #tpu.memory_space<vmem>>, vector<56x56xbf16>
    tpu.vector_store %arg7[%c0_43, %c0_44], %52 {strides = array<i32>} : memref<56x56xbf16, #tpu.memory_space<vmem>>, vector<56x56xbf16>,
    %c0_45 = arith.constant 0 : index
    %c0_46 = arith.constant 0 : index
    %54 = vector.load %arg7[%c0_45, %c0_46] : memref<56x56xbf16, #tpu.memory_space<vmem>>, vector<56x56xbf16>
    %55 = vector.extract_strided_slice %54 {offsets = [0, 0], sizes = [8, 56], strides = [1, 1]} : vector<56x56xbf16> to vector<8x56xbf16>
    %c0_47 = arith.constant 0 : index
    %c0_48 = arith.constant 0 : index
    %56 = vector.load %arg9[%c0_47, %c0_48] : memref<24x168xbf16, #tpu.memory_space<vmem>>, vector<8x56xbf16>
    tpu.vector_store %arg9[%c0_47, %c0_48], %55 {strides = array<i32>} : memref<24x168xbf16, #tpu.memory_space<vmem>>, vector<8x56xbf16>,
    %57 = vector.extract_strided_slice %54 {offsets = [16, 0], sizes = [8, 56], strides = [1, 1]} : vector<56x56xbf16> to vector<8x56xbf16>
    %c8_49 = arith.constant 8 : index
    %c0_50 = arith.constant 0 : index
    %58 = vector.load %arg9[%c8_49, %c0_50] : memref<24x168xbf16, #tpu.memory_space<vmem>>, vector<8x56xbf16>
    tpu.vector_store %arg9[%c8_49, %c0_50], %57 {strides = array<i32>} : memref<24x168xbf16, #tpu.memory_space<vmem>>, vector<8x56xbf16>,
    %59 = vector.extract_strided_slice %54 {offsets = [32, 0], sizes = [8, 56], strides = [1, 1]} : vector<56x56xbf16> to vector<8x56xbf16>
    %c16_51 = arith.constant 16 : index
    %c0_52 = arith.constant 0 : index
    %60 = vector.load %arg9[%c16_51, %c0_52] : memref<24x168xbf16, #tpu.memory_space<vmem>>, vector<8x56xbf16>
    tpu.vector_store %arg9[%c16_51, %c0_52], %59 {strides = array<i32>} : memref<24x168xbf16, #tpu.memory_space<vmem>>, vector<8x56xbf16>,
    %61 = vector.extract_strided_slice %54 {offsets = [8, 0], sizes = [8, 56], strides = [1, 1]} : vector<56x56xbf16> to vector<8x56xbf16>
    %c0_53 = arith.constant 0 : index
    %c56 = arith.constant 56 : index
    %62 = vector.load %arg9[%c0_53, %c56] : memref<24x168xbf16, #tpu.memory_space<vmem>>, vector<8x56xbf16>
    tpu.vector_store %arg9[%c0_53, %c56], %61 {strides = array<i32>} : memref<24x168xbf16, #tpu.memory_space<vmem>>, vector<8x56xbf16>,
    %63 = vector.extract_strided_slice %54 {offsets = [24, 0], sizes = [8, 56], strides = [1, 1]} : vector<56x56xbf16> to vector<8x56xbf16>
    %c8_54 = arith.constant 8 : index
    %c56_55 = arith.constant 56 : index
    %64 = vector.load %arg9[%c8_54, %c56_55] : memref<24x168xbf16, #tpu.memory_space<vmem>>, vector<8x56xbf16>
    tpu.vector_store %arg9[%c8_54, %c56_55], %63 {strides = array<i32>} : memref<24x168xbf16, #tpu.memory_space<vmem>>, vector<8x56xbf16>,
    %65 = vector.extract_strided_slice %54 {offsets = [40, 0], sizes = [8, 56], strides = [1, 1]} : vector<56x56xbf16> to vector<8x56xbf16>
    %c16_56 = arith.constant 16 : index
    %c56_57 = arith.constant 56 : index
    %66 = vector.load %arg9[%c16_56, %c56_57] : memref<24x168xbf16, #tpu.memory_space<vmem>>, vector<8x56xbf16>
    tpu.vector_store %arg9[%c16_56, %c56_57], %65 {strides = array<i32>} : memref<24x168xbf16, #tpu.memory_space<vmem>>, vector<8x56xbf16>,
    %67 = vector.extract_strided_slice %54 {offsets = [16, 0], sizes = [8, 56], strides = [1, 1]} : vector<56x56xbf16> to vector<8x56xbf16>
    %c0_58 = arith.constant 0 : index
    %c112 = arith.constant 112 : index
    %68 = vector.load %arg9[%c0_58, %c112] : memref<24x168xbf16, #tpu.memory_space<vmem>>, vector<8x56xbf16>
    tpu.vector_store %arg9[%c0_58, %c112], %67 {strides = array<i32>} : memref<24x168xbf16, #tpu.memory_space<vmem>>, vector<8x56xbf16>,
    %69 = vector.extract_strided_slice %54 {offsets = [32, 0], sizes = [8, 56], strides = [1, 1]} : vector<56x56xbf16> to vector<8x56xbf16>
    %c8_59 = arith.constant 8 : index
    %c112_60 = arith.constant 112 : index
    %70 = vector.load %arg9[%c8_59, %c112_60] : memref<24x168xbf16, #tpu.memory_space<vmem>>, vector<8x56xbf16>
    tpu.vector_store %arg9[%c8_59, %c112_60], %69 {strides = array<i32>} : memref<24x168xbf16, #tpu.memory_space<vmem>>, vector<8x56xbf16>,
    %71 = vector.extract_strided_slice %54 {offsets = [48, 0], sizes = [8, 56], strides = [1, 1]} : vector<56x56xbf16> to vector<8x56xbf16>
    %c16_61 = arith.constant 16 : index
    %c112_62 = arith.constant 112 : index
    %72 = vector.load %arg9[%c16_61, %c112_62] : memref<24x168xbf16, #tpu.memory_space<vmem>>, vector<8x56xbf16>
    tpu.vector_store %arg9[%c16_61, %c112_62], %71 {strides = array<i32>} : memref<24x168xbf16, #tpu.memory_space<vmem>>, vector<8x56xbf16>,
    %c0_63 = arith.constant 0 : index
    %c0_64 = arith.constant 0 : index
    %73 = vector.load %arg9[%c0_63, %c0_64] : memref<24x168xbf16, #tpu.memory_space<vmem>>, vector<24x168xbf16>
    %c0_65 = arith.constant 0 : index
    %c0_66 = arith.constant 0 : index
    %74 = vector.load %arg4[%c0_65, %c0_66] : memref<168x24xbf16, #tpu.memory_space<vmem>>, vector<168x24xbf16>
    %cst_67 = arith.constant dense<0.000000e+00> : vector<24x24xf32>
    %75 = tpu.matmul %73, %74, %cst_67 {dimension_numbers = #tpu.dot_dimension_numbers<[1], [0], [0], [1], [0, 0, 1, 1], [], []>} : vector<24x168xbf16>, vector<168x24xbf16>, vector<24x24xf32> -> vector<24x24xf32>
    %c0_68 = arith.constant 0 : index
    %c0_69 = arith.constant 0 : index
    %76 = vector.load %arg5[%c0_68, %c0_69] : memref<1x24xf32, #tpu.memory_space<vmem>>, vector<1x24xf32>
    %77 = vector.broadcast %76 : vector<1x24xf32> to vector<24x24xf32>
    %78 = arith.addf %75, %77 : vector<24x24xf32>
    %cst_70 = arith.constant 0.000000e+00 : f32
    %79 = vector.broadcast %cst_70 : f32 to vector<24x24xf32>
    %80 = arith.maximumf %78, %79 : vector<24x24xf32>
    %c0_71 = arith.constant 0 : index
    %c0_72 = arith.constant 0 : index
    %c0_73 = arith.constant 0 : index
    %81 = vector.load %arg6[%c0_71, %c0_72, %c0_73] : memref<1x24x24xf32, #tpu.memory_space<vmem>>, vector<1x24x24xf32>
    %82 = vector.shape_cast %81 : vector<1x24x24xf32> to vector<24x24xf32>
    %83 = vector.shape_cast %80 : vector<24x24xf32> to vector<1x24x24xf32>
    tpu.vector_store %arg6[%c0_71, %c0_72, %c0_73], %83 {strides = array<i32>} : memref<1x24x24xf32, #tpu.memory_space<vmem>>, vector<1x24x24xf32>,
    return
  }
  func.func @transform_0(%arg0: i32) -> (i32, i32, i32) {
    %c0_i32 = arith.constant 0 : i32
    %c0_i32_0 = arith.constant 0 : i32
    %c0_i32_1 = arith.constant 0 : i32
    return %arg0, %c0_i32, %c0_i32_0 : i32, i32, i32
  }
  func.func @transform_1(%arg0: i32) -> (i32, i32) {
    %c0_i32 = arith.constant 0 : i32
    %c0_i32_0 = arith.constant 0 : i32
    %c0_i32_1 = arith.constant 0 : i32
    return %c0_i32, %c0_i32_0 : i32, i32
  }
  func.func @transform_2(%arg0: i32) -> (i32, i32) {
    %c0_i32 = arith.constant 0 : i32
    %c0_i32_0 = arith.constant 0 : i32
    %c0_i32_1 = arith.constant 0 : i32
    return %c0_i32, %c0_i32_0 : i32, i32
  }
  func.func @transform_3(%arg0: i32) -> (i32, i32) {
    %c0_i32 = arith.constant 0 : i32
    %c0_i32_0 = arith.constant 0 : i32
    %c0_i32_1 = arith.constant 0 : i32
    return %c0_i32, %c0_i32_0 : i32, i32
  }
  func.func @transform_4(%arg0: i32) -> (i32, i32) {
    %c0_i32 = arith.constant 0 : i32
    %c0_i32_0 = arith.constant 0 : i32
    %c0_i32_1 = arith.constant 0 : i32
    return %c0_i32, %c0_i32_0 : i32, i32
  }
  func.func @transform_5(%arg0: i32) -> (i32, i32, i32) {
    %c0_i32 = arith.constant 0 : i32
    %c0_i32_0 = arith.constant 0 : i32
    %c0_i32_1 = arith.constant 0 : i32
    return %arg0, %c0_i32, %c0_i32_0 : i32, i32, i32
  }
}

</mosaic_0001>

<bundles_post_ra>
// kernel: tile.10
= control target key start
LH: loop header
LB: loop body
LE: loop exit
PB: predicated region body
PF: predicated region fallthrough
CT: control target
= control target key end

     0   :  { %s22_s0 = inlined_call_operand.vmem [shape: f32[8], index: 0, kind: input, shape index: {}]   ;;  %s23_s1 = inlined_call_operand.vmem [shape: f32[7,8], index: 1, kind: output, shape index: {}]  }
   0x1   :  { %v4_v0 = vld [vmem:[%s22_s0] ss:$0 sm:$0xff] }
   0x2   :  { %5 = vst [vmem:[%s23_s1] sm:$0xff] %v4_v0 }

// kernel: tile.11
= control target key start
LH: loop header
LB: loop body
LE: loop exit
PB: predicated region body
PF: predicated region fallthrough
CT: control target
= control target key end

     0   :  { %s59_s10 = smov 48   ;;  %s60_s11 = smov 32   ;;  %vm3_vm0 = vcmask 64512   ;;  %vm9_vm1 = vcmask 458112   ;;  %vm15_vm2 = vcmask 392512   ;;  %vm21_vm3 = vcmask 326912   ;;  %s99_s0 = inlined_call_operand.vmem [shape: f32[7,8], index: 0, kind: input, shape index: {}]   ;;  %s100_s1 = inlined_call_operand.vmem [shape: f32[1,56], index: 1, kind: output, shape index: {}]  }
   0x1   :  { %v47_v0 = vld [vmem:[%s99_s0 + $0x6] sm:$0x1]   ;;  %v49_v1 = vld [vmem:[%s99_s0 + $0x4] sm:$0x1]   ;;  %v48_v2 = vld [vmem:[%s99_s0 + $0x5] sm:$0x1]  }
   0x2   :  { %7 = vrot.lane.b32.xlu0 %v47_v0, %s59_s10  ;;  %19 = vrot.lane.b32.xlu1 %v49_v1, %s60_s11  ;;  %v50_v3 = vld [vmem:[%s99_s0 + $0x3] sm:$0x1]   ;;  %v2_v4 = vld [vmem:[%s99_s0] sm:$0x1]   ;;  %s61_s18 = smov 40   ;;  %s62_s19 = smov 24  }
   0x3   :  { %4 = vst.msk [vmem:[#allocation0] sm:$0x1] %vm3_vm0, %v2_v4   ;;  %v51_v5 = vld [vmem:[%s99_s0 + $0x2] sm:$0x1]   ;;  %v52_v6 = vld [vmem:[%s99_s0 + $0x1] sm:$0x1]  }
   0x4   :  { %s63_s0 = smov 16   ;;  %s64_s24 = smov 8   ;;  %vm27_vm4 = vcmask 261312   ;;  %vm33_vm5 = vcmask 195712   ;;  %vm39_vm6 = vcmask 130112  }
   0x6   :  { %13 = vrot.lane.b32.xlu0 %v48_v2, %s61_s18  ;;  %25 = vrot.lane.b32.xlu1 %v50_v3, %s62_s19 }
   0xa   :  { %31 = vrot.lane.b32.xlu0 %v51_v5, %s63_s0  ;;  %37 = vrot.lane.b32.xlu1 %v52_v6, %s64_s24 }
  0x74   :  { %v8_v7 = vpop.permute.xlu0 %7   ;;  %v20_v8 = vpop.permute.xlu1 %19  }
  0x75   :  { %10 = vst.msk [vmem:[#allocation0] sm:$0x1] %vm9_vm1, %v8_v7  }
  0x78   :  { %v14_v9 = vpop.permute.xlu0 %13   ;;  %v26_v10 = vpop.permute.xlu1 %25  }
  0x79   :  { %16 = vst.msk [vmem:[#allocation0] sm:$0x1] %vm15_vm2, %v14_v9  }
  0x7a   :  { %22 = vst.msk [vmem:[#allocation0] sm:$0x1] %vm21_vm3, %v20_v8  }
  0x7b   :  { %28 = vst.msk [vmem:[#allocation0] sm:$0x1] %vm27_vm4, %v26_v10  }
  0x7c   :  { %v32_v11 = vpop.permute.xlu0 %31   ;;  %v38_v12 = vpop.permute.xlu1 %37  }
  0x7d   :  { %34 = vst.msk [vmem:[#allocation0] sm:$0x1] %vm33_vm5, %v32_v11  }
  0x7e   :  { %40 = vst.msk [vmem:[#allocation0] sm:$0x1] %vm39_vm6, %v38_v12  }
  0x85   :  { %v44_v13 = vld [vmem:[#allocation0] sm:$0x1] }
  0x86   :  { %46 = vst [vmem:[%s100_s1] sm:$0x1] %v44_v13 }

// kernel: tile.14
= control target key start
LH: loop header
LB: loop body
LE: loop exit
PB: predicated region body
PF: predicated region fallthrough
CT: control target
= control target key end

     0   :  { %s22_s0 = inlined_call_operand.vmem [shape: f32[8], index: 0, kind: input, shape index: {}]   ;;  %s23_s1 = inlined_call_operand.vmem [shape: f32[3,8], index: 1, kind: output, shape index: {}]  }
   0x1   :  { %v4_v0 = vld [vmem:[%s22_s0] ss:$0 sm:$0xff] }
   0x2   :  { %5 = vst [vmem:[%s23_s1] sm:$0xf] %v4_v0 }

// kernel: tile.15
= control target key start
LH: loop header
LB: loop body
LE: loop exit
PB: predicated region body
PF: predicated region fallthrough
CT: control target
= control target key end

     0   :  { %vm7_vm0 = vcmask 64512   ;;  %s30_s8 = smov 8   ;;  %vm13_vm1 = vcmask 195712   ;;  %vm19_vm2 = vcmask 130112   ;;  %s47_s0 = inlined_call_operand.vmem [shape: f32[3,8], index: 0, kind: input, shape index: {}]   ;;  %s48_s1 = inlined_call_operand.vmem [shape: f32[1,24], index: 1, kind: output, shape index: {}]  }
   0x1   :  { %v4_v0 = vld [vmem:[%s47_s0] sm:$0xf]  ;;  %s29_s0 = smov 16  }
   0x2   :  { %5 = vst [vmem:[#allocation1] sm:$0xf] %v4_v0 }
   0x9   :  { %v10_v1 = vld [vmem:[#allocation1 + $0x2] sm:$0x1]   ;;  %v6_v2 = vld [vmem:[#allocation1] sm:$0x1]   ;;  %v16_v3 = vld [vmem:[#allocation1 + $0x1] sm:$0x1]  }
   0xa   :  { %11 = vrot.lane.b32.xlu0 %v10_v1, %s29_s0  ;;  %8 = vst.msk [vmem:[#allocation0] sm:$0x1] %vm7_vm0, %v6_v2  }
   0xe   :  { %17 = vrot.lane.b32.xlu0 %v16_v3, %s30_s8 }
  0x7c   :  { %v12_v4 = vpop.permute.xlu0 %11  }
  0x7d   :  { %14 = vst.msk [vmem:[#allocation0] sm:$0x1] %vm13_vm1, %v12_v4  }
  0x80   :  { %v18_v5 = vpop.permute.xlu0 %17  }
  0x81   :  { %20 = vst.msk [vmem:[#allocation0] sm:$0x1] %vm19_vm2, %v18_v5  }
  0x88   :  { %v24_v6 = vld [vmem:[#allocation0] sm:$0x1] }
  0x89   :  { %26 = vst [vmem:[%s48_s1] sm:$0x1] %v24_v6 }

// kernel: _lambda_.1
= control target key start
LH: loop header
LB: loop body
LE: loop exit
PB: predicated region body
PF: predicated region fallthrough
CT: control target
= control target key end

     0   :  { %v680_v2 = vmov 0   ;;  %s681_s22 = smov 64   ;;  %vm36_vm0 = vcmask 519168   ;;  %vm48_vm1 = vcmask 1043968   ;;  %vm230_vm2 = vcmask 523264   ;;  %s682_s14 = smov 112   ;;  %s917_s0 = inlined_call_operand.vmem [shape: bf16[1,128,64], index: 0, kind: input, shape index: {}]   ;;  %s918_s1 = inlined_call_operand.vmem [shape: bf16[192,56], index: 1, kind: input, shape index: {}]   ;;  %s919_s3 = inlined_call_operand.vmem [shape: bf16[168,24], index: 3, kind: input, shape index: {}]   ;;  %s920_s2 = inlined_call_operand.vmem [shape: f32[1,56], index: 2, kind: input, shape index: {}]   ;;  %s921_s4 = inlined_call_operand.vmem [shape: f32[1,24], index: 4, kind: input, shape index: {}]   ;;  %s922_s5 = inlined_call_operand.vmem [shape: f32[1,24,24], index: 5, kind: output, shape index: {}]  }
   0x1   :  { %v22_v0 = vld [vmem:[%s917_s0 + $0x4] sm:$0xf]  ;;  %v26_v1 = vld [vmem:[%s917_s0 + $0x14] sm:$0xf]  ;;  %243 = vmatprep.subr.bf16.mxu0 %v680_v2  ;;  %522 = vmatprep.subr.bf16.mxu1 %v680_v2  ;;  %v24_v3 = vld [vmem:[%s917_s0 + $0xc] sm:$0xf] }
   0x2   :  { %45 = vrot.lane.b32.xlu0 %v22_v0, %s681_s22  ;;  %56 = vrot.lane.b32.xlu1 %v26_v1, %s681_s22  ;;  %v28_v4 = vld [vmem:[%s917_s0 + $0x1c] sm:$0xf]  ;;  %v642_v5 = vld [vmem:[%s918_s1] sm:$0xff]   ;;  %vm343_vm3 = vcmask 453632   ;;  %s683_s17 = smov 56   ;;  %vm518_vm4 = vcmask 1043456  }
   0x3   :  { %v32_v6 = vld [vmem:[%s917_s0 + $0x2c] sm:$0xf]  ;;  %v30_v7 = vld [vmem:[%s917_s0 + $0x24] sm:$0xf]  ;;  %244 = vmatpush1.bf16.msra.mxu0 %v642_v5  ;;  %v34_v9 = vld [vmem:[%s917_s0 + $0x34] sm:$0xf] }
   0x4   :  { %v643_v8 = vld [vmem:[%s918_s1 + $0x8] sm:$0xff]   ;;  %245 = vmatprep.subr.bf16.mxu0 %v680_v2  ;;  %v644_v10 = vld [vmem:[%s918_s1 + $0x10] sm:$0xff]   ;;  %v21_v11 = vld [vmem:[%s917_s0] sm:$0xf]  ;;  %vm384_vm5 = vcmask 1044352   ;;  %vm385_vm6 = vcmask 326660  }
   0x5   :  { %37 = vst.msk [vmem:[#allocation3] sm:$0xf] %vm36_vm0, %v21_v11  ;;  %v25_v12 = vld [vmem:[%s917_s0 + $0x10] sm:$0xf]  ;;  %v23_v13 = vld [vmem:[%s917_s0 + $0x8] sm:$0xf]  ;;  %vm892_vm9 = vmor %vm385_vm6, %vm384_vm5 }
   0x6   :  { %51 = vrot.lane.b32.xlu0 %v24_v3, %s681_s22  ;;  %61 = vrot.lane.b32.xlu1 %v28_v4, %s681_s22  ;;  %39 = vst.msk [vmem:[#allocation3 + $0x10] sm:$0xf] %vm36_vm0, %v25_v12  ;;  %81 = vst.msk [vmem:[#allocation3 + $0xc] sm:$0xf] %vm36_vm0, %v25_v12  ;;  %v645_v14 = vld [vmem:[%s918_s1 + $0x18] sm:$0xff]   ;;  %v646_v20 = vld [vmem:[%s918_s1 + $0x20] sm:$0xff]  }
   0x7   :  { %246 = vmatpush1.bf16.msra.mxu0 %v643_v8  ;;  %38 = vst.msk [vmem:[#allocation3 + $0x8] sm:$0xf] %vm36_vm0, %v23_v13  ;;  %80 = vst.msk [vmem:[#allocation3 + $0x4] sm:$0xf] %vm36_vm0, %v23_v13  ;;  %v27_v15 = vld [vmem:[%s917_s0 + $0x18] sm:$0xf] }
   0x8   :  { %247 = vmatprep.subr.bf16.mxu0 %v680_v2  ;;  %40 = vst.msk [vmem:[#allocation3 + $0x18] sm:$0xf] %vm36_vm0, %v27_v15  ;;  %82 = vst.msk [vmem:[#allocation3 + $0x14] sm:$0xf] %vm36_vm0, %v27_v15  ;;  %v29_v16 = vld [vmem:[%s917_s0 + $0x20] sm:$0xf] }
   0x9   :  { %83 = vst.msk [vmem:[#allocation3 + $0x1c] sm:$0xf] %vm36_vm0, %v29_v16  ;;  %41 = vst.msk [vmem:[#allocation3 + $0x20] sm:$0xf] %vm36_vm0, %v29_v16  ;;  %v31_v17 = vld [vmem:[%s917_s0 + $0x28] sm:$0xf] }
   0xa   :  { %71 = vrot.lane.b32.xlu1 %v32_v6, %s681_s22  ;;  %66 = vrot.lane.b32.xlu0 %v30_v7, %s681_s22  ;;  %v33_v18 = vld [vmem:[%s917_s0 + $0x30] sm:$0xf]  ;;  %v35_v19 = vld [vmem:[%s917_s0 + $0x38] sm:$0xf]  ;;  %42 = vst.msk [vmem:[#allocation3 + $0x28] sm:$0xf] %vm36_vm0, %v31_v17 }
   0xb   :  { %248 = vmatpush1.bf16.msra.mxu0 %v644_v10  ;;  %84 = vst.msk [vmem:[#allocation3 + $0x24] sm:$0xf] %vm36_vm0, %v31_v17  ;;  %43 = vst.msk [vmem:[#allocation3 + $0x30] sm:$0xf] %vm36_vm0, %v33_v18  ;;  %v647_v21 = vld [vmem:[%s918_s1 + $0x28] sm:$0xff]   ;;  %v648_v22 = vld [vmem:[%s918_s1 + $0x30] sm:$0xff]  }
   0xc   :  { %249 = vmatprep.subr.bf16.mxu0 %v680_v2  ;;  %85 = vst.msk [vmem:[#allocation3 + $0x2c] sm:$0xf] %vm36_vm0, %v33_v18  ;;  %86 = vst.msk [vmem:[#allocation3 + $0x34] sm:$0xf] %vm36_vm0, %v35_v19  ;;  %v649_v23 = vld [vmem:[%s918_s1 + $0x38] sm:$0xff]   ;;  %v650_v24 = vld [vmem:[%s918_s1 + $0x40] sm:$0xff]  }
   0xd   :  { %v651_v25 = vld [vmem:[%s918_s1 + $0x48] sm:$0xff]   ;;  %v652_v26 = vld [vmem:[%s918_s1 + $0x50] sm:$0xff]   ;;  %v653_v27 = vld [vmem:[%s918_s1 + $0x58] sm:$0xff]   ;;  %vm381_vm7 = vcmask 916480   ;;  %vm365_vm8 = vcmask 912832   ;;  %vm511_vm10 = vcmask 326656  }
   0xe   :  { %76 = vrot.lane.b32.xlu0 %v34_v9, %s681_s22  ;;  %v656_v35 = vld [vmem:[#allocation3 + $0x4] ss:$8 sps:$4 sm:$0xff]   ;;  %v666_v48 = vld [vmem:[%s919_s3 + $0x10] sm:$0xff]   ;;  %v667_v49 = vld [vmem:[%s919_s3 + $0x18] sm:$0xff]   ;;  %vm573_vm11 = vcmask 195584  }
   0xf   :  { %250 = vmatpush1.bf16.msra.mxu0 %v645_v14  ;;  %602 = vmatprep.mubr.msk.bf16.mxu0 %vm230_vm2, %v656_v35  ;;  %v664_v46 = vld [vmem:[%s919_s3] sm:$0xff]   ;;  %v665_v47 = vld [vmem:[%s919_s3 + $0x8] sm:$0xff]   ;;  %v670_v7 = vld [vmem:[%s919_s3 + $0x30] sm:$0xff]  }
  0x10   :  { %251 = vmatprep.subr.bf16.mxu0 %v680_v2  ;;  %v657_v37 = vld [vmem:[#allocation3 + $0x14] ss:$8 sps:$4 sm:$0xff]   ;;  %523 = vmatpush1.bf16.msra.mxu1 %v664_v46  ;;  %v668_v50 = vld [vmem:[%s919_s3 + $0x20] sm:$0xff]   ;;  %v669_v63 = vld [vmem:[%s919_s3 + $0x28] sm:$0xff]  }
  0x11   :  { %524 = vmatprep.subr.bf16.mxu1 %v680_v2  ;;  %v581_v51 = vld [vmem:[%s920_s2] ss:$0 sm:$0xff]  ;;  %v671_v13 = vld [vmem:[%s919_s3 + $0x38] sm:$0xff]  }
  0x13   :  { %252 = vmatpush1.bf16.msra.mxu0 %v646_v20  ;;  %v659_v40 = vld [vmem:[#allocation3 + $0x24] ss:$8 sps:$4 sm:$0xff]  }
  0x14   :  { %253 = vmatprep.subr.bf16.mxu0 %v680_v2  ;;  %525 = vmatpush1.bf16.msra.mxu1 %v665_v47  ;;  %v672_v20 = vld [vmem:[%s919_s3 + $0x40] sm:$0xff]  }
  0x15   :  { %526 = vmatprep.subr.bf16.mxu1 %v680_v2 }
  0x17   :  { %254 = vmatpush1.bf16.msra.mxu0 %v647_v21 }
  0x18   :  { %255 = vmatprep.subr.bf16.mxu0 %v680_v2  ;;  %527 = vmatpush1.bf16.msra.mxu1 %v666_v48 }
  0x19   :  { %528 = vmatprep.subr.bf16.mxu1 %v680_v2 }
  0x1b   :  { %256 = vmatpush1.bf16.msra.mxu0 %v648_v22 }
  0x1c   :  { %257 = vmatprep.subr.bf16.mxu0 %v680_v2  ;;  %529 = vmatpush1.bf16.msra.mxu1 %v667_v49 }
  0x1d   :  { %530 = vmatprep.subr.bf16.mxu1 %v680_v2 }
  0x1f   :  { %258 = vmatpush1.bf16.msra.mxu0 %v649_v23 }
  0x20   :  { %259 = vmatprep.subr.bf16.mxu0 %v680_v2  ;;  %531 = vmatpush1.bf16.msra.mxu1 %v668_v50 }
  0x21   :  { %532 = vmatprep.subr.bf16.mxu1 %v680_v2 }
  0x23   :  { %260 = vmatpush1.bf16.msra.mxu0 %v650_v24 }
  0x24   :  { %261 = vmatprep.subr.bf16.mxu0 %v680_v2  ;;  %533 = vmatpush1.bf16.msra.mxu1 %v669_v63 }
  0x25   :  { %534 = vmatprep.subr.bf16.mxu1 %v680_v2 }
  0x27   :  { %262 = vmatpush1.bf16.msra.mxu0 %v651_v25 }
  0x28   :  { %263 = vmatprep.subr.bf16.mxu0 %v680_v2  ;;  %535 = vmatpush1.bf16.msra.mxu1 %v670_v7 }
  0x29   :  { %536 = vmatprep.subr.bf16.mxu1 %v680_v2 }
  0x2b   :  { %264 = vmatpush1.bf16.msra.mxu0 %v652_v26  ;;  %v673_v26 = vld [vmem:[%s919_s3 + $0x48] sm:$0xff]  }
  0x2c   :  { %265 = vmatprep.subr.bf16.mxu0 %v680_v2  ;;  %537 = vmatpush1.bf16.msra.mxu1 %v671_v13 }
  0x2d   :  { %538 = vmatprep.subr.bf16.mxu1 %v680_v2 }
  0x2f   :  { %266 = vmatpush1.bf16.msra.mxu0 %v653_v27 }
  0x30   :  { %539 = vmatpush1.bf16.msra.mxu1 %v672_v20 }
  0x31   :  { %540 = vmatprep.subr.bf16.mxu1 %v680_v2 }
  0x34   :  { %541 = vmatpush1.bf16.msra.mxu1 %v673_v26 }
  0x35   :  { %542 = vmatprep.subr.bf16.mxu1 %v680_v2 }
  0x74   :  { %v46_v28 = vpop.permute.xlu0 %45  ;;  %v57_v29 = vpop.permute.xlu1 %56 }
  0x75   :  { %49 = vst.msk [vmem:[#allocation3] sm:$0xf] %vm48_vm1, %v46_v28  ;;  %59 = vst.msk [vmem:[#allocation3 + $0x10] sm:$0xf] %vm48_vm1, %v57_v29 }
  0x78   :  { %v52_v30 = vpop.permute.xlu0 %51  ;;  %v62_v31 = vpop.permute.xlu1 %61 }
  0x79   :  { %54 = vst.msk [vmem:[#allocation3 + $0x8] sm:$0xf] %vm48_vm1, %v52_v30  ;;  %64 = vst.msk [vmem:[#allocation3 + $0x18] sm:$0xf] %vm48_vm1, %v62_v31 }
  0x7c   :  { %v72_v32 = vpop.permute.xlu1 %71  ;;  %v67_v33 = vpop.permute.xlu0 %66  ;;  %v89_v38 = vld [vmem:[#allocation3 + $0x10] sm:$0xff] }
  0x7d   :  { %74 = vst.msk [vmem:[#allocation3 + $0x28] sm:$0xf] %vm48_vm1, %v72_v32  ;;  %69 = vst.msk [vmem:[#allocation3 + $0x20] sm:$0xf] %vm48_vm1, %v67_v33  ;;  %v674_v33 = vld [vmem:[%s919_s3 + $0x50] ss:$0 sps:$4 sm:$0xff]  }
  0x7e   :  { %v520_v35 = vsel %vm518_vm4, %v674_v33, 0 }
  0x7f   :  { %543 = vmatpush1.bf16.msra.mxu1 %v520_v35 }
  0x80   :  { %v654_v34 = vld [vmem:[#allocation3] ss:$8 sps:$4 sm:$0xff]   ;;  %v77_v36 = vpop.permute.xlu0 %76  ;;  %v90_v39 = vld [vmem:[#allocation3 + $0x18] sm:$0xff] }
  0x81   :  { %79 = vst.msk [vmem:[#allocation3 + $0x30] sm:$0xf] %vm48_vm1, %v77_v36  ;;  %276 = vmatmul.mubr.bf16.vlgmr.msra.gmra.mrb[0].mxu0 %v654_v34  ;;  %v584_v41 = vcombine.low %v89_v38, %v90_v39 }
  0x82   :  { %603 = vmatprep.mubr.msk.bf16.mxu0 %vm230_vm2, %v657_v37 }
  0x84   :  { %v661_v43 = vld [vmem:[#allocation3 + $0x20] ss:$8 sps:$4 sm:$0xff]  }
  0x88   :  { %v93_v42 = vld [vmem:[#allocation3 + $0x30] sm:$0xff] }
  0x89   :  { %284 = vmatmul.mubr.bf16.gmra.mrb[4].mxu0 %v584_v41  ;;  %v589_v44 = vcombine.high %v93_v42, %v93_v42  ;;  %v588_v45 = vcombine.low %v93_v42, %v93_v42 }
  0x8a   :  { %604 = vmatprep.mubr.msk.bf16.mxu0 %vm230_vm2, %v659_v40 }
  0x91   :  { %292 = vmatmul.mubr.bf16.gmra.mrb[8].mxu0 %v661_v43 }
  0x92   :  { %605 = vmatprep.mubr.msk.bf16.mxu0 %vm230_vm2, %v589_v44 }
  0x99   :  { %300 = vmatmul.mubr.bf16.gmra.mrb[12].mxu0 %v588_v45 }
 0x154   :  { %v277_v52 = vpop.f32.mrb[0].mxu0 }
 0x155   :  { %v278_v53 = vadd.f32 %v581_v51, %v277_v52  ;;  %v279_v54 = vpop.f32.mrb[1].mxu0 }
 0x156   :  { %v280_v55 = vpop.f32.mrb[2].mxu0 }
 0x157   :  { %v307_v56 = vmax.f32 %v278_v53, 0.0  ;;  %v281_v57 = vadd.f32 %v581_v51, %v280_v55  ;;  %v282_v58 = vpop.f32.mrb[3].mxu0 }
 0x159   :  { %v631_v59 = vpack.c.bf16 %v307_v56, %v307_v56  ;;  %v308_v60 = vmax.f32 %v281_v57, 0.0  ;;  %v613_v57 = vld [vmem:[%s921_s4] ss:$0 sm:$0xff] }
 0x15b   :  { %344 = vst.msk [vmem:[#allocation2] sm:$0xf] %vm343_vm3, %v631_v59  ;;  %v632_v61 = vpack.c.bf16 %v308_v60, %v308_v60 }
 0x15c   :  { %v285_v62 = vpop.f32.mrb[4].mxu0 }
 0x15d   :  { %345 = vst.msk [vmem:[#allocation2 + $0x4] sm:$0xf] %vm343_vm3, %v632_v61  ;;  %v286_v0 = vadd.f32 %v581_v51, %v285_v62  ;;  %v287_v1 = vpop.f32.mrb[5].mxu0 }
 0x15e   :  { %v288_v3 = vpop.f32.mrb[6].mxu0 }
 0x15f   :  { %v309_v4 = vmax.f32 %v286_v0, 0.0  ;;  %v289_v5 = vadd.f32 %v581_v51, %v288_v3  ;;  %v290_v6 = vpop.f32.mrb[7].mxu0 }
 0x161   :  { %v633_v8 = vpack.c.bf16 %v309_v4, %v309_v4  ;;  %v310_v9 = vmax.f32 %v289_v5, 0.0 }
 0x162   :  { %v351_v10 = vld [vmem:[#allocation2] sm:$0xf] }
 0x163   :  { %346 = vst.msk [vmem:[#allocation2 + $0x8] sm:$0xf] %vm343_vm3, %v633_v8  ;;  %v634_v11 = vpack.c.bf16 %v310_v9, %v310_v9  ;;  %358 = vst.msk [vmem:[#allocation4] sm:$0xf] %vm343_vm3, %v351_v10 }
 0x164   :  { %v293_v12 = vpop.f32.mrb[8].mxu0  ;;  %v352_v30 = vld [vmem:[#allocation2 + $0x4] sm:$0xf] }
 0x165   :  { %347 = vst.msk [vmem:[#allocation2 + $0xc] sm:$0xf] %vm343_vm3, %v634_v11  ;;  %v294_v14 = vadd.f32 %v581_v51, %v293_v12  ;;  %v295_v15 = vpop.f32.mrb[9].mxu0 }
 0x166   :  { %v296_v16 = vpop.f32.mrb[10].mxu0 }
 0x167   :  { %v311_v17 = vmax.f32 %v294_v14, 0.0  ;;  %v297_v18 = vadd.f32 %v581_v51, %v296_v16  ;;  %v298_v19 = vpop.f32.mrb[11].mxu0 }
 0x169   :  { %v635_v21 = vpack.c.bf16 %v311_v17, %v311_v17  ;;  %v312_v22 = vmax.f32 %v297_v18, 0.0 }
 0x16a   :  { %v353_v23 = vld [vmem:[#allocation2 + $0x8] sm:$0xf] }
 0x16b   :  { %348 = vst.msk [vmem:[#allocation2 + $0x10] sm:$0xf] %vm343_vm3, %v635_v21  ;;  %v636_v24 = vpack.c.bf16 %v312_v22, %v312_v22  ;;  %378 = vrot.lane.b32.xlu1 %v353_v23, %s682_s14  ;;  %359 = vst.msk [vmem:[#allocation4 + $0x8] sm:$0xf] %vm343_vm3, %v353_v23 }
 0x16c   :  { %v301_v25 = vpop.f32.mrb[12].mxu0  ;;  %v354_v37 = vld [vmem:[#allocation2 + $0xc] sm:$0xf] }
 0x16d   :  { %349 = vst.msk [vmem:[#allocation2 + $0x14] sm:$0xf] %vm343_vm3, %v636_v24  ;;  %v302_v27 = vadd.f32 %v581_v51, %v301_v25  ;;  %v303_v28 = vpop.f32.mrb[13].mxu0 }
 0x16e   :  { %v304_v29 = vpop.f32.mrb[14].mxu0 }
 0x16f   :  { %v313_v31 = vmax.f32 %v302_v27, 0.0  ;;  %v305_v32 = vpop.f32.mrb[15].mxu0  ;;  %362 = vrot.lane.b32.xlu1 %v352_v30, %s683_s17 }
 0x171   :  { %v637_v34 = vpack.c.bf16 %v313_v31, %v313_v31 }
 0x172   :  { %v355_v36 = vld [vmem:[#allocation2 + $0x10] sm:$0xf] }
 0x173   :  { %350 = vst.msk [vmem:[#allocation2 + $0x18] sm:$0xf] %vm343_vm3, %v637_v34  ;;  %389 = vrot.lane.b32.xlu0 %v355_v36, %s682_s14  ;;  %360 = vst.msk [vmem:[#allocation4 + $0x10] sm:$0xf] %vm343_vm3, %v355_v36 }
 0x174   :  { %v356_v38 = vld [vmem:[#allocation2 + $0x14] sm:$0xf] }
 0x177   :  { %368 = vrot.lane.b32.xlu0 %v354_v37, %s683_s17 }
 0x17a   :  { %v357_v39 = vld [vmem:[#allocation2 + $0x18] sm:$0xf] }
 0x17b   :  { %373 = vrot.lane.b32.xlu0 %v356_v38, %s683_s17  ;;  %396 = vrot.lane.b32.xlu1 %v357_v39, %s682_s14 }
 0x1dd   :  { %v379_v2 = vpop.permute.xlu1 %378 }
 0x1de   :  { %v380_v40 = vrot.slane %v379_v2, 4 }
 0x1e0   :  { %v382_v43 = vsel %vm381_vm7, %v380_v40, %v379_v2 }
 0x1e1   :  { %v363_v42 = vpop.permute.xlu1 %362 }
 0x1e2   :  { %366 = vst.msk [vmem:[#allocation4] sm:$0xf] %vm365_vm8, %v363_v42 }
 0x1e3   :  { %387 = vst.msk [vmem:[#allocation4] sm:$0xff] %vm892_vm9, %v382_v43 }
 0x1e5   :  { %v390_v44 = vpop.permute.xlu0 %389 }
 0x1e6   :  { %v391_v45 = vrot.slane %v390_v44, 4 }
 0x1e8   :  { %v392_v47 = vsel %vm381_vm7, %v391_v45, %v390_v44 }
 0x1e9   :  { %v369_v46 = vpop.permute.xlu0 %368 }
 0x1ea   :  { %371 = vst.msk [vmem:[#allocation4 + $0x8] sm:$0xf] %vm365_vm8, %v369_v46 }
 0x1eb   :  { %394 = vst.msk [vmem:[#allocation4 + $0x8] sm:$0xff] %vm892_vm9, %v392_v47 }
 0x1ed   :  { %v374_v48 = vpop.permute.xlu0 %373  ;;  %v397_v49 = vpop.permute.xlu1 %396 }
 0x1ee   :  { %376 = vst.msk [vmem:[#allocation4 + $0x10] sm:$0xf] %vm365_vm8, %v374_v48  ;;  %v398_v50 = vrot.slane %v397_v49, 4 }
 0x1f0   :  { %v399_v51 = vsel %vm381_vm7, %v398_v50, %v397_v49 }
 0x1f1   :  { %401 = vst.msk [vmem:[#allocation4 + $0x10] sm:$0xff] %vm892_vm9, %v399_v51 }
 0x1f2   :  { %v675_v52 = vld [vmem:[#allocation4] ss:$8 sps:$4 sm:$0xff]   ;;  %v677_v53 = vld [vmem:[#allocation4 + $0x4] ss:$8 sps:$4 sm:$0xff]  }
 0x1f3   :  { %629 = vmatprep.mubr.msk.bf16.mxu1 %vm511_vm10, %v677_v53 }
 0x1f4   :  { %555 = vmatmul.mubr.bf16.vlgmr.msra.gmra.mrb[0].mxu1 %v675_v52 }
 0x1f8   :  { %v404_v54 = vld [vmem:[#allocation4 + $0x10] sm:$0xff] }
 0x1f9   :  { %v617_v55 = vcombine.high %v404_v54, %v404_v54  ;;  %v616_v56 = vcombine.low %v404_v54, %v404_v54 }
 0x1fb   :  { %630 = vmatprep.mubr.msk.bf16.mxu1 %vm511_vm10, %v617_v55 }
 0x1fc   :  { %563 = vmatmul.mubr.bf16.gmra.mrb[4].mxu1 %v616_v56 }
 0x2c7   :  { %v556_v58 = vpop.f32.mrb[0].mxu1 }
 0x2c8   :  { %v557_v59 = vadd.f32 %v613_v57, %v556_v58  ;;  %v558_v60 = vpop.f32.mrb[1].mxu1 }
 0x2c9   :  { %v559_v61 = vpop.f32.mrb[2].mxu1 }
 0x2ca   :  { %v570_v62 = vmax.f32 %v557_v59, 0.0  ;;  %v560_v63 = vadd.f32 %v613_v57, %v559_v61  ;;  %v561_v0 = vpop.f32.mrb[3].mxu1 }
 0x2cc   :  { %574 = vst.msk [vmem:[%s922_s5] sm:$0xff] %vm573_vm11, %v570_v62  ;;  %v571_v1 = vmax.f32 %v560_v63, 0.0 }
 0x2ce   :  { %575 = vst.msk [vmem:[%s922_s5 + $0x8] sm:$0xff] %vm573_vm11, %v571_v1 }
 0x2cf   :  { %v564_v3 = vpop.f32.mrb[4].mxu1 }
 0x2d0   :  { %v565_v4 = vadd.f32 %v613_v57, %v564_v3  ;;  %v566_v5 = vpop.f32.mrb[5].mxu1 }
 0x2d1   :  { %v567_v6 = vpop.f32.mrb[6].mxu1 }
 0x2d2   :  { %v572_v7 = vmax.f32 %v565_v4, 0.0  ;;  %v568_v8 = vpop.f32.mrb[7].mxu1 }
 0x2d4   :  { %576 = vst.msk [vmem:[%s922_s5 + $0x10] sm:$0xff] %vm573_vm11, %v572_v7 }

</bundles_post_ra>
